<compile_context>
chip_gen: v5e
topology: v5e:2x2
jax: 0.10.0
libtpu: 0.0.40
codegen_flags: <defaults>
</compile_context>

<pallas_src>
import functools
import math

import jax
import jax.numpy as jnp
from jax import lax
from jax.experimental import pallas as pl
from jax.experimental.pallas import tpu as pltpu


def _round_up(a, m):
    return -(-a // m) * m


def _conv_gelu_kernel(x_ref, w_ref, b_ref, o_ref, xs_ref, rhs_ref, *,
                      K, cg, L, TL, X0, p0, slab_len, W_wide, n_chunks, l_last):
    # x_ref : (1, 1, cg, L)      bf16  this (batch, group)'s input channels
    # w_ref : (1, cg, K*cg)      bf16  group's stacked weights, row = out-ch, col = k*cg+i
    # b_ref : (1, cg, 1)         f32   group's bias
    # o_ref : (1, 1, cg, L)      f32   gelu(conv(x))[:, :, :L]
    # xs_ref: (cg, slab_len)     bf16  zero-haloed copy of x (data starts at column X0)
    # rhs_ref:(K*cg, TL)         bf16  per-chunk im2col slab

    # Zero only the halo columns (left pad + right pad/overrun).  Done every grid step
    # (cheap: a few hundred columns) so the kernel stays correct if the grid is split
    # across TensorCores; the data region is fully overwritten below.
    if X0 > 0:
        xs_ref[:, :X0] = jnp.zeros((cg, X0), jnp.bfloat16)
    right = slab_len - (X0 + L)
    if right > 0:
        xs_ref[:, X0 + L:] = jnp.zeros((cg, right), jnp.bfloat16)
    # Aligned, bf16->bf16 (no convert) fill of the data region at a 128-aligned column.
    xs_ref[:, X0:X0 + L] = x_ref[0, 0]

    # Hoisted bias broadcast (JAX does not CSE broadcast_in_dim inside the chunk loop).
    bias_full = jnp.broadcast_to(b_ref[0], (cg, TL))

    def compute_chunk(t0, width):
        # One aligned wide load covering every tap of this output chunk.
        wide = xs_ref[:, pl.ds(t0, W_wide)]                    # (cg, W_wide) bf16
        # im2col with *static* offsets only: tap k -> rows [k*cg, (k+1)*cg).
        for k in range(K):
            rhs_ref[k * cg:(k + 1) * cg, :width] = wide[:, p0 + k:p0 + k + width]
        # Single MXU contraction over all taps and in-channels (depth = K*cg).
        acc = jnp.dot(w_ref[0], rhs_ref[:, :width],
                      preferred_element_type=jnp.float32)      # (cg, width) f32
        y = acc + bias_full[:, :width]
        # tanh-GELU: runs on the EUP (idle next to MXU/loads); |delta vs erf| ~1e-3,
        # below the bf16 matmul error.
        y = 0.5 * y * (1.0 + jnp.tanh(0.7978845608028654 *
                                      (y + 0.044715 * y * y * y)))
        o_ref[0, 0, :, pl.ds(t0, width)] = y.astype(o_ref.dtype)

    if n_chunks > 1:
        @pl.loop(0, n_chunks - 1)
        def _(t):
            compute_chunk(pl.multiple_of(t * TL, TL), TL)      # lane-dense full chunks
    compute_chunk((n_chunks - 1) * TL, l_last)                 # static-width tail


def positional_conv_embedding(x, weight_v, weight_g, bias, *,
                              kernel_size, groups, chunk=256):
    """x: (B, D, L).  weight_v: (D, D//groups, K), weight_g: (K,), bias: (D,)."""
    B, D, L = x.shape
    K = int(kernel_size)
    G = int(groups)
    assert D % G == 0
    # The unconditional [:, :, :-1] trim only matches the PyTorch module for even K.
    assert K % 2 == 0, "PositionalConvEmbedding kernel assumes even kernel_size"
    cg = D // G
    pad = K // 2
    TL = int(chunk)
    assert TL % 128 == 0

    # weight_norm with dim=2: w[:, :, k] = g[k] * v[:, :, k] / ||v[:, :, k]||_F
    v = weight_v.astype(jnp.float32)
    v_norm = jnp.sqrt(jnp.sum(v * v, axis=(0, 1), keepdims=True))      # (1, 1, K)
    w = v * (weight_g.astype(jnp.float32)[None, None, :] / v_norm)     # (D, cg, K)

    # Per-group stacked bf16 weights: (G, cg_out, K*cg_in), contraction index k*cg+i.
    w = w.reshape(G, cg, cg, K)            # (g, o, i, k)
    w = w.transpose(0, 1, 3, 2)            # (g, o, k, i)
    w = w.reshape(G, cg, K * cg).astype(jnp.bfloat16)

    bias_g = bias.astype(jnp.float32).reshape(G, cg, 1)

    # bf16 cast + group split in the wrapper (one fused XLA op; halves input DMA bytes).
    # Note: the kernel computes the conv in bf16 (f32 accumulate) -- ~1e-2 abs noise.
    x_bf = x.reshape(B, G, cg, L).astype(jnp.bfloat16)

    X0 = _round_up(pad, 128) if pad > 0 else 0   # 128-aligned data start inside xs
    p0 = X0 - pad                                # static in-window phase, 0 <= p0 < 128
    n_chunks = -(-L // TL)
    l_last = L - (n_chunks - 1) * TL
    W_wide = _round_up(p0 + K + TL, 128)         # window covering all taps of a chunk
    slab_len = _round_up(max(X0 + L + pad, (n_chunks - 1) * TL + W_wide), 128)

    kernel = functools.partial(
        _conv_gelu_kernel, K=K, cg=cg, L=L, TL=TL, X0=X0, p0=p0,
        slab_len=slab_len, W_wide=W_wide, n_chunks=n_chunks, l_last=l_last)

    cost = pl.CostEstimate(
        flops=int(2 * B * D * cg * K * L),
        transcendentals=int(B * D * L),
        bytes_accessed=int(x_bf.size * 2 + w.size * 2 + bias_g.size * 4
                           + B * D * L * x.dtype.itemsize))

    out = pl.pallas_call(
        kernel,
        out_shape=jax.ShapeDtypeStruct((B, G, cg, L), x.dtype),
        grid_spec=pltpu.PrefetchScalarGridSpec(
            num_scalar_prefetch=0,
            grid=(G, B),          # group outermost -> weight block resident across batch
            in_specs=[
                pl.BlockSpec((1, 1, cg, L), lambda g, b: (b, g, 0, 0)),
                pl.BlockSpec((1, cg, K * cg), lambda g, b: (g, 0, 0)),
                pl.BlockSpec((1, cg, 1), lambda g, b: (g, 0, 0)),
            ],
            out_specs=pl.BlockSpec((1, 1, cg, L), lambda g, b: (b, g, 0, 0)),
            scratch_shapes=[
                pltpu.VMEM((cg, slab_len), jnp.bfloat16),   # zero-haloed input slab
                pltpu.VMEM((K * cg, TL), jnp.bfloat16),     # per-chunk im2col slab
            ],
        ),
        compiler_params=pltpu.CompilerParams(
            dimension_semantics=("parallel", "parallel")),
        cost_estimate=cost,
    )(x_bf, w, bias_g)
    return out.reshape(B, D, L)


def _reference(x, weight_v, weight_g, bias, *, kernel_size, groups):
    """Plain-JAX reference mirroring the PyTorch forward (f32, exact erf GELU)."""
    v_norm = jnp.sqrt(jnp.sum(weight_v ** 2, axis=(0, 1), keepdims=True))
    weight = weight_v * (weight_g[None, None, :] / v_norm)   # (O, I/G, K)
    y = lax.conv_general_dilated(
        x, weight,
        window_strides=(1,),
        padding=[(kernel_size // 2, kernel_size // 2)],
        dimension_numbers=("NCH", "OIH", "NCH"),
        feature_group_count=groups,
    ) + bias[None, :, None]
    y = y[:, :, :-1]
    return 0.5 * y * (1.0 + lax.erf(y / math.sqrt(2.0)))


if __name__ == "__main__":
    # Small, shape-consistent configuration (module defaults are dim=768, K=128, G=16).
    B, D, L = 2, 32, 300
    K, G = 16, 4

    key = jax.random.PRNGKey(0)
    kx, kv, kg, kb = jax.random.split(key, 4)

    x = jax.random.normal(kx, (B, D, L), dtype=jnp.float32)
    weight_v = jax.random.normal(kv, (D, D // G, K), dtype=jnp.float32) * 0.1
    weight_g = jax.random.uniform(kg, (K,), dtype=jnp.float32, minval=0.5, maxval=1.5)
    bias = jax.random.normal(kb, (D,), dtype=jnp.float32) * 0.05

    ref = _reference(x, weight_v, weight_g, bias, kernel_size=K, groups=G)

    # chunk=256 fills the 256-wide MXU (v6e/v7x); chunk=128 exercises more chunk/tail paths.
    for tl in (256, 128):
        out = positional_conv_embedding(
            x, weight_v, weight_g, bias, kernel_size=K, groups=G, chunk=tl)
        out = jax.block_until_ready(out)
        if not jnp.allclose(out, ref, atol=5e-2, rtol=5e-2):
            err = float(jnp.max(jnp.abs(out - ref)))
            raise AssertionError(
                f"Pallas kernel does not match reference (chunk={tl}, max_abs_err={err})")

    print("KERNEL_OK")
</pallas_src>

<mosaic_0001>
module attributes {stable_mosaic.version = 11 : i64} {
  func.func @_conv_gelu_kernel(%arg0: i32, %arg1: i32, %arg2: memref<1x1x8x300xbf16, #tpu.memory_space<vmem>>, %arg3: memref<1x8x128xbf16, #tpu.memory_space<vmem>>, %arg4: memref<1x8x1xf32, #tpu.memory_space<vmem>>, %arg5: memref<1x1x8x300xf32, #tpu.memory_space<vmem>>, %arg6: memref<8x768xbf16, #tpu.memory_space<vmem>>, %arg7: memref<128x256xbf16, #tpu.memory_space<vmem>>) attributes {dimension_semantics = [#tpu.dimension_semantics<parallel>, #tpu.dimension_semantics<parallel>], iteration_bounds = array<i64: 4, 2>, scalar_prefetch = 0 : i64, scratch_operands = 2 : i64, tpu.core_type = #tpu.core_type<tc>, window_params = [{transform_indices = @transform_0, window_bounds = array<i64: 1, 1, 8, 300>}, {transform_indices = @transform_1, window_bounds = array<i64: 1, 8, 128>}, {transform_indices = @transform_2, window_bounds = array<i64: 1, 8, 1>}, {transform_indices = @transform_3, window_bounds = array<i64: 1, 1, 8, 300>}]} {
    %cst = arith.constant 0.000000e+00 : bf16
    %0 = vector.broadcast %cst : bf16 to vector<8x128xbf16>
    %c0 = arith.constant 0 : index
    %c0_0 = arith.constant 0 : index
    %1 = vector.load %arg6[%c0, %c0_0] : memref<8x768xbf16, #tpu.memory_space<vmem>>, vector<8x128xbf16>
    tpu.vector_store %arg6[%c0, %c0_0], %0 {strides = array<i32>} : memref<8x768xbf16, #tpu.memory_space<vmem>>, vector<8x128xbf16>,
    %cst_1 = arith.constant 0.000000e+00 : bf16
    %2 = vector.broadcast %cst_1 : bf16 to vector<8x340xbf16>
    %c0_2 = arith.constant 0 : index
    %c428 = arith.constant 428 : index
    %3 = vector.load %arg6[%c0_2, %c428] : memref<8x768xbf16, #tpu.memory_space<vmem>>, vector<8x340xbf16>
    tpu.vector_store %arg6[%c0_2, %c428], %2 {strides = array<i32>} : memref<8x768xbf16, #tpu.memory_space<vmem>>, vector<8x340xbf16>,
    %c0_3 = arith.constant 0 : index
    %c0_4 = arith.constant 0 : index
    %c0_5 = arith.constant 0 : index
    %c0_6 = arith.constant 0 : index
    %4 = vector.load %arg2[%c0_3, %c0_4, %c0_5, %c0_6] : memref<1x1x8x300xbf16, #tpu.memory_space<vmem>>, vector<1x1x8x300xbf16>
    %5 = vector.shape_cast %4 : vector<1x1x8x300xbf16> to vector<8x300xbf16>
    %c0_7 = arith.constant 0 : index
    %c128 = arith.constant 128 : index
    %6 = vector.load %arg6[%c0_7, %c128] : memref<8x768xbf16, #tpu.memory_space<vmem>>, vector<8x300xbf16>
    tpu.vector_store %arg6[%c0_7, %c128], %5 {strides = array<i32>} : memref<8x768xbf16, #tpu.memory_space<vmem>>, vector<8x300xbf16>,
    %c0_8 = arith.constant 0 : index
    %c0_9 = arith.constant 0 : index
    %c0_10 = arith.constant 0 : index
    %7 = vector.load %arg4[%c0_8, %c0_9, %c0_10] : memref<1x8x1xf32, #tpu.memory_space<vmem>>, vector<1x8x1xf32>
    %8 = vector.shape_cast %7 : vector<1x8x1xf32> to vector<8x1xf32>
    %9 = vector.shape_cast %8 : vector<8x1xf32> to vector<8x1xf32>
    %10 = vector.broadcast %9 : vector<8x1xf32> to vector<8x256xf32>
    %c0_i32 = arith.constant 0 : i32
    %c1_i32 = arith.constant 1 : i32
    %11 = arith.muli %c0_i32, %c1_i32 : i32
    %c0_i32_11 = arith.constant 0 : i32
    %12 = arith.addi %c0_i32_11, %11 : i32
    %c256_i32 = arith.constant 256 : i32
    %13 = arith.muli %12, %c256_i32 : i32
    %14 = tpu.assume_multiple %13, 256 : i32
    %c0_12 = arith.constant 0 : index
    %15 = arith.index_cast %14 : i32 to index
    %16 = vector.load %arg6[%c0_12, %15] : memref<8x768xbf16, #tpu.memory_space<vmem>>, vector<8x512xbf16>
    %17 = vector.extract_strided_slice %16 {offsets = [0, 120], sizes = [8, 256], strides = [1, 1]} : vector<8x512xbf16> to vector<8x256xbf16>
    %c0_13 = arith.constant 0 : index
    %c0_14 = arith.constant 0 : index
    %18 = vector.load %arg7[%c0_13, %c0_14] : memref<128x256xbf16, #tpu.memory_space<vmem>>, vector<8x256xbf16>
    tpu.vector_store %arg7[%c0_13, %c0_14], %17 {strides = array<i32>} : memref<128x256xbf16, #tpu.memory_space<vmem>>, vector<8x256xbf16>,
    %19 = vector.extract_strided_slice %16 {offsets = [0, 121], sizes = [8, 256], strides = [1, 1]} : vector<8x512xbf16> to vector<8x256xbf16>
    %c8 = arith.constant 8 : index
    %c0_15 = arith.constant 0 : index
    %20 = vector.load %arg7[%c8, %c0_15] : memref<128x256xbf16, #tpu.memory_space<vmem>>, vector<8x256xbf16>
    tpu.vector_store %arg7[%c8, %c0_15], %19 {strides = array<i32>} : memref<128x256xbf16, #tpu.memory_space<vmem>>, vector<8x256xbf16>,
    %21 = vector.extract_strided_slice %16 {offsets = [0, 122], sizes = [8, 256], strides = [1, 1]} : vector<8x512xbf16> to vector<8x256xbf16>
    %c16 = arith.constant 16 : index
    %c0_16 = arith.constant 0 : index
    %22 = vector.load %arg7[%c16, %c0_16] : memref<128x256xbf16, #tpu.memory_space<vmem>>, vector<8x256xbf16>
    tpu.vector_store %arg7[%c16, %c0_16], %21 {strides = array<i32>} : memref<128x256xbf16, #tpu.memory_space<vmem>>, vector<8x256xbf16>,
    %23 = vector.extract_strided_slice %16 {offsets = [0, 123], sizes = [8, 256], strides = [1, 1]} : vector<8x512xbf16> to vector<8x256xbf16>
    %c24 = arith.constant 24 : index
    %c0_17 = arith.constant 0 : index
    %24 = vector.load %arg7[%c24, %c0_17] : memref<128x256xbf16, #tpu.memory_space<vmem>>, vector<8x256xbf16>
    tpu.vector_store %arg7[%c24, %c0_17], %23 {strides = array<i32>} : memref<128x256xbf16, #tpu.memory_space<vmem>>, vector<8x256xbf16>,
    %25 = vector.extract_strided_slice %16 {offsets = [0, 124], sizes = [8, 256], strides = [1, 1]} : vector<8x512xbf16> to vector<8x256xbf16>
    %c32 = arith.constant 32 : index
    %c0_18 = arith.constant 0 : index
    %26 = vector.load %arg7[%c32, %c0_18] : memref<128x256xbf16, #tpu.memory_space<vmem>>, vector<8x256xbf16>
    tpu.vector_store %arg7[%c32, %c0_18], %25 {strides = array<i32>} : memref<128x256xbf16, #tpu.memory_space<vmem>>, vector<8x256xbf16>,
    %27 = vector.extract_strided_slice %16 {offsets = [0, 125], sizes = [8, 256], strides = [1, 1]} : vector<8x512xbf16> to vector<8x256xbf16>
    %c40 = arith.constant 40 : index
    %c0_19 = arith.constant 0 : index
    %28 = vector.load %arg7[%c40, %c0_19] : memref<128x256xbf16, #tpu.memory_space<vmem>>, vector<8x256xbf16>
    tpu.vector_store %arg7[%c40, %c0_19], %27 {strides = array<i32>} : memref<128x256xbf16, #tpu.memory_space<vmem>>, vector<8x256xbf16>,
    %29 = vector.extract_strided_slice %16 {offsets = [0, 126], sizes = [8, 256], strides = [1, 1]} : vector<8x512xbf16> to vector<8x256xbf16>
    %c48 = arith.constant 48 : index
    %c0_20 = arith.constant 0 : index
    %30 = vector.load %arg7[%c48, %c0_20] : memref<128x256xbf16, #tpu.memory_space<vmem>>, vector<8x256xbf16>
    tpu.vector_store %arg7[%c48, %c0_20], %29 {strides = array<i32>} : memref<128x256xbf16, #tpu.memory_space<vmem>>, vector<8x256xbf16>,
    %31 = vector.extract_strided_slice %16 {offsets = [0, 127], sizes = [8, 256], strides = [1, 1]} : vector<8x512xbf16> to vector<8x256xbf16>
    %c56 = arith.constant 56 : index
    %c0_21 = arith.constant 0 : index
    %32 = vector.load %arg7[%c56, %c0_21] : memref<128x256xbf16, #tpu.memory_space<vmem>>, vector<8x256xbf16>
    tpu.vector_store %arg7[%c56, %c0_21], %31 {strides = array<i32>} : memref<128x256xbf16, #tpu.memory_space<vmem>>, vector<8x256xbf16>,
    %33 = vector.extract_strided_slice %16 {offsets = [0, 128], sizes = [8, 256], strides = [1, 1]} : vector<8x512xbf16> to vector<8x256xbf16>
    %c64 = arith.constant 64 : index
    %c0_22 = arith.constant 0 : index
    %34 = vector.load %arg7[%c64, %c0_22] : memref<128x256xbf16, #tpu.memory_space<vmem>>, vector<8x256xbf16>
    tpu.vector_store %arg7[%c64, %c0_22], %33 {strides = array<i32>} : memref<128x256xbf16, #tpu.memory_space<vmem>>, vector<8x256xbf16>,
    %35 = vector.extract_strided_slice %16 {offsets = [0, 129], sizes = [8, 256], strides = [1, 1]} : vector<8x512xbf16> to vector<8x256xbf16>
    %c72 = arith.constant 72 : index
    %c0_23 = arith.constant 0 : index
    %36 = vector.load %arg7[%c72, %c0_23] : memref<128x256xbf16, #tpu.memory_space<vmem>>, vector<8x256xbf16>
    tpu.vector_store %arg7[%c72, %c0_23], %35 {strides = array<i32>} : memref<128x256xbf16, #tpu.memory_space<vmem>>, vector<8x256xbf16>,
    %37 = vector.extract_strided_slice %16 {offsets = [0, 130], sizes = [8, 256], strides = [1, 1]} : vector<8x512xbf16> to vector<8x256xbf16>
    %c80 = arith.constant 80 : index
    %c0_24 = arith.constant 0 : index
    %38 = vector.load %arg7[%c80, %c0_24] : memref<128x256xbf16, #tpu.memory_space<vmem>>, vector<8x256xbf16>
    tpu.vector_store %arg7[%c80, %c0_24], %37 {strides = array<i32>} : memref<128x256xbf16, #tpu.memory_space<vmem>>, vector<8x256xbf16>,
    %39 = vector.extract_strided_slice %16 {offsets = [0, 131], sizes = [8, 256], strides = [1, 1]} : vector<8x512xbf16> to vector<8x256xbf16>
    %c88 = arith.constant 88 : index
    %c0_25 = arith.constant 0 : index
    %40 = vector.load %arg7[%c88, %c0_25] : memref<128x256xbf16, #tpu.memory_space<vmem>>, vector<8x256xbf16>
    tpu.vector_store %arg7[%c88, %c0_25], %39 {strides = array<i32>} : memref<128x256xbf16, #tpu.memory_space<vmem>>, vector<8x256xbf16>,
    %41 = vector.extract_strided_slice %16 {offsets = [0, 132], sizes = [8, 256], strides = [1, 1]} : vector<8x512xbf16> to vector<8x256xbf16>
    %c96 = arith.constant 96 : index
    %c0_26 = arith.constant 0 : index
    %42 = vector.load %arg7[%c96, %c0_26] : memref<128x256xbf16, #tpu.memory_space<vmem>>, vector<8x256xbf16>
    tpu.vector_store %arg7[%c96, %c0_26], %41 {strides = array<i32>} : memref<128x256xbf16, #tpu.memory_space<vmem>>, vector<8x256xbf16>,
    %43 = vector.extract_strided_slice %16 {offsets = [0, 133], sizes = [8, 256], strides = [1, 1]} : vector<8x512xbf16> to vector<8x256xbf16>
    %c104 = arith.constant 104 : index
    %c0_27 = arith.constant 0 : index
    %44 = vector.load %arg7[%c104, %c0_27] : memref<128x256xbf16, #tpu.memory_space<vmem>>, vector<8x256xbf16>
    tpu.vector_store %arg7[%c104, %c0_27], %43 {strides = array<i32>} : memref<128x256xbf16, #tpu.memory_space<vmem>>, vector<8x256xbf16>,
    %45 = vector.extract_strided_slice %16 {offsets = [0, 134], sizes = [8, 256], strides = [1, 1]} : vector<8x512xbf16> to vector<8x256xbf16>
    %c112 = arith.constant 112 : index
    %c0_28 = arith.constant 0 : index
    %46 = vector.load %arg7[%c112, %c0_28] : memref<128x256xbf16, #tpu.memory_space<vmem>>, vector<8x256xbf16>
    tpu.vector_store %arg7[%c112, %c0_28], %45 {strides = array<i32>} : memref<128x256xbf16, #tpu.memory_space<vmem>>, vector<8x256xbf16>,
    %47 = vector.extract_strided_slice %16 {offsets = [0, 135], sizes = [8, 256], strides = [1, 1]} : vector<8x512xbf16> to vector<8x256xbf16>
    %c120 = arith.constant 120 : index
    %c0_29 = arith.constant 0 : index
    %48 = vector.load %arg7[%c120, %c0_29] : memref<128x256xbf16, #tpu.memory_space<vmem>>, vector<8x256xbf16>
    tpu.vector_store %arg7[%c120, %c0_29], %47 {strides = array<i32>} : memref<128x256xbf16, #tpu.memory_space<vmem>>, vector<8x256xbf16>,
    %c0_30 = arith.constant 0 : index
    %c0_31 = arith.constant 0 : index
    %c0_32 = arith.constant 0 : index
    %49 = vector.load %arg3[%c0_30, %c0_31, %c0_32] : memref<1x8x128xbf16, #tpu.memory_space<vmem>>, vector<1x8x128xbf16>
    %50 = vector.shape_cast %49 : vector<1x8x128xbf16> to vector<8x128xbf16>
    %c0_33 = arith.constant 0 : index
    %c0_34 = arith.constant 0 : index
    %51 = vector.load %arg7[%c0_33, %c0_34] : memref<128x256xbf16, #tpu.memory_space<vmem>>, vector<128x256xbf16>
    %cst_35 = arith.constant dense<0.000000e+00> : vector<8x256xf32>
    %52 = tpu.matmul %50, %51, %cst_35 {dimension_numbers = #tpu.dot_dimension_numbers<[1], [0], [0], [1], [0, 0, 1, 1], [], []>} : vector<8x128xbf16>, vector<128x256xbf16>, vector<8x256xf32> -> vector<8x256xf32>
    %53 = arith.addf %52, %10 : vector<8x256xf32>
    %cst_36 = arith.constant 5.000000e-01 : f32
    %54 = vector.broadcast %cst_36 : f32 to vector<8x256xf32>
    %55 = arith.mulf %54, %53 : vector<8x256xf32>
    %cst_37 = arith.constant 4.471500e-02 : f32
    %56 = vector.broadcast %cst_37 : f32 to vector<8x256xf32>
    %57 = arith.mulf %56, %53 : vector<8x256xf32>
    %58 = arith.mulf %57, %53 : vector<8x256xf32>
    %59 = arith.mulf %58, %53 : vector<8x256xf32>
    %60 = arith.addf %53, %59 : vector<8x256xf32>
    %cst_38 = arith.constant 0.797884583 : f32
    %61 = vector.broadcast %cst_38 : f32 to vector<8x256xf32>
    %62 = arith.mulf %61, %60 : vector<8x256xf32>
    %63 = math.tanh %62 : vector<8x256xf32>
    %cst_39 = arith.constant 1.000000e+00 : f32
    %64 = vector.broadcast %cst_39 : f32 to vector<8x256xf32>
    %65 = arith.addf %64, %63 : vector<8x256xf32>
    %66 = arith.mulf %55, %65 : vector<8x256xf32>
    %c0_40 = arith.constant 0 : index
    %c0_41 = arith.constant 0 : index
    %c0_42 = arith.constant 0 : index
    %67 = arith.index_cast %14 : i32 to index
    %68 = vector.load %arg5[%c0_40, %c0_41, %c0_42, %67] : memref<1x1x8x300xf32, #tpu.memory_space<vmem>>, vector<1x1x8x256xf32>
    %69 = vector.shape_cast %68 : vector<1x1x8x256xf32> to vector<8x256xf32>
    %70 = vector.shape_cast %66 : vector<8x256xf32> to vector<1x1x8x256xf32>
    tpu.vector_store %arg5[%c0_40, %c0_41, %c0_42, %67], %70 {strides = array<i32>} : memref<1x1x8x300xf32, #tpu.memory_space<vmem>>, vector<1x1x8x256xf32>,
    %c1_i32_43 = arith.constant 1 : i32
    %c0_44 = arith.constant 0 : index
    %c256 = arith.constant 256 : index
    %71 = vector.load %arg6[%c0_44, %c256] : memref<8x768xbf16, #tpu.memory_space<vmem>>, vector<8x512xbf16>
    %72 = vector.extract_strided_slice %71 {offsets = [0, 120], sizes = [8, 44], strides = [1, 1]} : vector<8x512xbf16> to vector<8x44xbf16>
    %c0_45 = arith.constant 0 : index
    %c0_46 = arith.constant 0 : index
    %73 = vector.load %arg7[%c0_45, %c0_46] : memref<128x256xbf16, #tpu.memory_space<vmem>>, vector<8x44xbf16>
    tpu.vector_store %arg7[%c0_45, %c0_46], %72 {strides = array<i32>} : memref<128x256xbf16, #tpu.memory_space<vmem>>, vector<8x44xbf16>,
    %74 = vector.extract_strided_slice %71 {offsets = [0, 121], sizes = [8, 44], strides = [1, 1]} : vector<8x512xbf16> to vector<8x44xbf16>
    %c8_47 = arith.constant 8 : index
    %c0_48 = arith.constant 0 : index
    %75 = vector.load %arg7[%c8_47, %c0_48] : memref<128x256xbf16, #tpu.memory_space<vmem>>, vector<8x44xbf16>
    tpu.vector_store %arg7[%c8_47, %c0_48], %74 {strides = array<i32>} : memref<128x256xbf16, #tpu.memory_space<vmem>>, vector<8x44xbf16>,
    %76 = vector.extract_strided_slice %71 {offsets = [0, 122], sizes = [8, 44], strides = [1, 1]} : vector<8x512xbf16> to vector<8x44xbf16>
    %c16_49 = arith.constant 16 : index
    %c0_50 = arith.constant 0 : index
    %77 = vector.load %arg7[%c16_49, %c0_50] : memref<128x256xbf16, #tpu.memory_space<vmem>>, vector<8x44xbf16>
    tpu.vector_store %arg7[%c16_49, %c0_50], %76 {strides = array<i32>} : memref<128x256xbf16, #tpu.memory_space<vmem>>, vector<8x44xbf16>,
    %78 = vector.extract_strided_slice %71 {offsets = [0, 123], sizes = [8, 44], strides = [1, 1]} : vector<8x512xbf16> to vector<8x44xbf16>
    %c24_51 = arith.constant 24 : index
    %c0_52 = arith.constant 0 : index
    %79 = vector.load %arg7[%c24_51, %c0_52] : memref<128x256xbf16, #tpu.memory_space<vmem>>, vector<8x44xbf16>
    tpu.vector_store %arg7[%c24_51, %c0_52], %78 {strides = array<i32>} : memref<128x256xbf16, #tpu.memory_space<vmem>>, vector<8x44xbf16>,
    %80 = vector.extract_strided_slice %71 {offsets = [0, 124], sizes = [8, 44], strides = [1, 1]} : vector<8x512xbf16> to vector<8x44xbf16>
    %c32_53 = arith.constant 32 : index
    %c0_54 = arith.constant 0 : index
    %81 = vector.load %arg7[%c32_53, %c0_54] : memref<128x256xbf16, #tpu.memory_space<vmem>>, vector<8x44xbf16>
    tpu.vector_store %arg7[%c32_53, %c0_54], %80 {strides = array<i32>} : memref<128x256xbf16, #tpu.memory_space<vmem>>, vector<8x44xbf16>,
    %82 = vector.extract_strided_slice %71 {offsets = [0, 125], sizes = [8, 44], strides = [1, 1]} : vector<8x512xbf16> to vector<8x44xbf16>
    %c40_55 = arith.constant 40 : index
    %c0_56 = arith.constant 0 : index
    %83 = vector.load %arg7[%c40_55, %c0_56] : memref<128x256xbf16, #tpu.memory_space<vmem>>, vector<8x44xbf16>
    tpu.vector_store %arg7[%c40_55, %c0_56], %82 {strides = array<i32>} : memref<128x256xbf16, #tpu.memory_space<vmem>>, vector<8x44xbf16>,
    %84 = vector.extract_strided_slice %71 {offsets = [0, 126], sizes = [8, 44], strides = [1, 1]} : vector<8x512xbf16> to vector<8x44xbf16>
    %c48_57 = arith.constant 48 : index
    %c0_58 = arith.constant 0 : index
    %85 = vector.load %arg7[%c48_57, %c0_58] : memref<128x256xbf16, #tpu.memory_space<vmem>>, vector<8x44xbf16>
    tpu.vector_store %arg7[%c48_57, %c0_58], %84 {strides = array<i32>} : memref<128x256xbf16, #tpu.memory_space<vmem>>, vector<8x44xbf16>,
    %86 = vector.extract_strided_slice %71 {offsets = [0, 127], sizes = [8, 44], strides = [1, 1]} : vector<8x512xbf16> to vector<8x44xbf16>
    %c56_59 = arith.constant 56 : index
    %c0_60 = arith.constant 0 : index
    %87 = vector.load %arg7[%c56_59, %c0_60] : memref<128x256xbf16, #tpu.memory_space<vmem>>, vector<8x44xbf16>
    tpu.vector_store %arg7[%c56_59, %c0_60], %86 {strides = array<i32>} : memref<128x256xbf16, #tpu.memory_space<vmem>>, vector<8x44xbf16>,
    %88 = vector.extract_strided_slice %71 {offsets = [0, 128], sizes = [8, 44], strides = [1, 1]} : vector<8x512xbf16> to vector<8x44xbf16>
    %c64_61 = arith.constant 64 : index
    %c0_62 = arith.constant 0 : index
    %89 = vector.load %arg7[%c64_61, %c0_62] : memref<128x256xbf16, #tpu.memory_space<vmem>>, vector<8x44xbf16>
    tpu.vector_store %arg7[%c64_61, %c0_62], %88 {strides = array<i32>} : memref<128x256xbf16, #tpu.memory_space<vmem>>, vector<8x44xbf16>,
    %90 = vector.extract_strided_slice %71 {offsets = [0, 129], sizes = [8, 44], strides = [1, 1]} : vector<8x512xbf16> to vector<8x44xbf16>
    %c72_63 = arith.constant 72 : index
    %c0_64 = arith.constant 0 : index
    %91 = vector.load %arg7[%c72_63, %c0_64] : memref<128x256xbf16, #tpu.memory_space<vmem>>, vector<8x44xbf16>
    tpu.vector_store %arg7[%c72_63, %c0_64], %90 {strides = array<i32>} : memref<128x256xbf16, #tpu.memory_space<vmem>>, vector<8x44xbf16>,
    %92 = vector.extract_strided_slice %71 {offsets = [0, 130], sizes = [8, 44], strides = [1, 1]} : vector<8x512xbf16> to vector<8x44xbf16>
    %c80_65 = arith.constant 80 : index
    %c0_66 = arith.constant 0 : index
    %93 = vector.load %arg7[%c80_65, %c0_66] : memref<128x256xbf16, #tpu.memory_space<vmem>>, vector<8x44xbf16>
    tpu.vector_store %arg7[%c80_65, %c0_66], %92 {strides = array<i32>} : memref<128x256xbf16, #tpu.memory_space<vmem>>, vector<8x44xbf16>,
    %94 = vector.extract_strided_slice %71 {offsets = [0, 131], sizes = [8, 44], strides = [1, 1]} : vector<8x512xbf16> to vector<8x44xbf16>
    %c88_67 = arith.constant 88 : index
    %c0_68 = arith.constant 0 : index
    %95 = vector.load %arg7[%c88_67, %c0_68] : memref<128x256xbf16, #tpu.memory_space<vmem>>, vector<8x44xbf16>
    tpu.vector_store %arg7[%c88_67, %c0_68], %94 {strides = array<i32>} : memref<128x256xbf16, #tpu.memory_space<vmem>>, vector<8x44xbf16>,
    %96 = vector.extract_strided_slice %71 {offsets = [0, 132], sizes = [8, 44], strides = [1, 1]} : vector<8x512xbf16> to vector<8x44xbf16>
    %c96_69 = arith.constant 96 : index
    %c0_70 = arith.constant 0 : index
    %97 = vector.load %arg7[%c96_69, %c0_70] : memref<128x256xbf16, #tpu.memory_space<vmem>>, vector<8x44xbf16>
    tpu.vector_store %arg7[%c96_69, %c0_70], %96 {strides = array<i32>} : memref<128x256xbf16, #tpu.memory_space<vmem>>, vector<8x44xbf16>,
    %98 = vector.extract_strided_slice %71 {offsets = [0, 133], sizes = [8, 44], strides = [1, 1]} : vector<8x512xbf16> to vector<8x44xbf16>
    %c104_71 = arith.constant 104 : index
    %c0_72 = arith.constant 0 : index
    %99 = vector.load %arg7[%c104_71, %c0_72] : memref<128x256xbf16, #tpu.memory_space<vmem>>, vector<8x44xbf16>
    tpu.vector_store %arg7[%c104_71, %c0_72], %98 {strides = array<i32>} : memref<128x256xbf16, #tpu.memory_space<vmem>>, vector<8x44xbf16>,
    %100 = vector.extract_strided_slice %71 {offsets = [0, 134], sizes = [8, 44], strides = [1, 1]} : vector<8x512xbf16> to vector<8x44xbf16>
    %c112_73 = arith.constant 112 : index
    %c0_74 = arith.constant 0 : index
    %101 = vector.load %arg7[%c112_73, %c0_74] : memref<128x256xbf16, #tpu.memory_space<vmem>>, vector<8x44xbf16>
    tpu.vector_store %arg7[%c112_73, %c0_74], %100 {strides = array<i32>} : memref<128x256xbf16, #tpu.memory_space<vmem>>, vector<8x44xbf16>,
    %102 = vector.extract_strided_slice %71 {offsets = [0, 135], sizes = [8, 44], strides = [1, 1]} : vector<8x512xbf16> to vector<8x44xbf16>
    %c120_75 = arith.constant 120 : index
    %c0_76 = arith.constant 0 : index
    %103 = vector.load %arg7[%c120_75, %c0_76] : memref<128x256xbf16, #tpu.memory_space<vmem>>, vector<8x44xbf16>
    tpu.vector_store %arg7[%c120_75, %c0_76], %102 {strides = array<i32>} : memref<128x256xbf16, #tpu.memory_space<vmem>>, vector<8x44xbf16>,
    %c0_77 = arith.constant 0 : index
    %c0_78 = arith.constant 0 : index
    %c0_79 = arith.constant 0 : index
    %104 = vector.load %arg3[%c0_77, %c0_78, %c0_79] : memref<1x8x128xbf16, #tpu.memory_space<vmem>>, vector<1x8x128xbf16>
    %105 = vector.shape_cast %104 : vector<1x8x128xbf16> to vector<8x128xbf16>
    %c0_80 = arith.constant 0 : index
    %c0_81 = arith.constant 0 : index
    %106 = vector.load %arg7[%c0_80, %c0_81] : memref<128x256xbf16, #tpu.memory_space<vmem>>, vector<128x44xbf16>
    %cst_82 = arith.constant dense<0.000000e+00> : vector<8x44xf32>
    %107 = tpu.matmul %105, %106, %cst_82 {dimension_numbers = #tpu.dot_dimension_numbers<[1], [0], [0], [1], [0, 0, 1, 1], [], []>} : vector<8x128xbf16>, vector<128x44xbf16>, vector<8x44xf32> -> vector<8x44xf32>
    %108 = vector.extract_strided_slice %10 {offsets = [0, 0], sizes = [8, 44], strides = [1, 1]} : vector<8x256xf32> to vector<8x44xf32>
    %109 = arith.addf %107, %108 : vector<8x44xf32>
    %cst_83 = arith.constant 5.000000e-01 : f32
    %110 = vector.broadcast %cst_83 : f32 to vector<8x44xf32>
    %111 = arith.mulf %110, %109 : vector<8x44xf32>
    %cst_84 = arith.constant 4.471500e-02 : f32
    %112 = vector.broadcast %cst_84 : f32 to vector<8x44xf32>
    %113 = arith.mulf %112, %109 : vector<8x44xf32>
    %114 = arith.mulf %113, %109 : vector<8x44xf32>
    %115 = arith.mulf %114, %109 : vector<8x44xf32>
    %116 = arith.addf %109, %115 : vector<8x44xf32>
    %cst_85 = arith.constant 0.797884583 : f32
    %117 = vector.broadcast %cst_85 : f32 to vector<8x44xf32>
    %118 = arith.mulf %117, %116 : vector<8x44xf32>
    %119 = math.tanh %118 : vector<8x44xf32>
    %cst_86 = arith.constant 1.000000e+00 : f32
    %120 = vector.broadcast %cst_86 : f32 to vector<8x44xf32>
    %121 = arith.addf %120, %119 : vector<8x44xf32>
    %122 = arith.mulf %111, %121 : vector<8x44xf32>
    %c0_87 = arith.constant 0 : index
    %c0_88 = arith.constant 0 : index
    %c0_89 = arith.constant 0 : index
    %c256_90 = arith.constant 256 : index
    %123 = vector.load %arg5[%c0_87, %c0_88, %c0_89, %c256_90] : memref<1x1x8x300xf32, #tpu.memory_space<vmem>>, vector<1x1x8x44xf32>
    %124 = vector.shape_cast %123 : vector<1x1x8x44xf32> to vector<8x44xf32>
    %125 = vector.shape_cast %122 : vector<8x44xf32> to vector<1x1x8x44xf32>
    tpu.vector_store %arg5[%c0_87, %c0_88, %c0_89, %c256_90], %125 {strides = array<i32>} : memref<1x1x8x300xf32, #tpu.memory_space<vmem>>, vector<1x1x8x44xf32>,
    return
  }
  func.func @transform_0(%arg0: i32, %arg1: i32) -> (i32, i32, i32, i32) {
    %c0_i32 = arith.constant 0 : i32
    %c0_i32_0 = arith.constant 0 : i32
    %c0_i32_1 = arith.constant 0 : i32
    return %arg1, %arg0, %c0_i32, %c0_i32_0 : i32, i32, i32, i32
  }
  func.func @transform_1(%arg0: i32, %arg1: i32) -> (i32, i32, i32) {
    %c0_i32 = arith.constant 0 : i32
    %c0_i32_0 = arith.constant 0 : i32
    %c0_i32_1 = arith.constant 0 : i32
    return %arg0, %c0_i32, %c0_i32_0 : i32, i32, i32
  }
  func.func @transform_2(%arg0: i32, %arg1: i32) -> (i32, i32, i32) {
    %c0_i32 = arith.constant 0 : i32
    %c0_i32_0 = arith.constant 0 : i32
    %c0_i32_1 = arith.constant 0 : i32
    return %arg0, %c0_i32, %c0_i32_0 : i32, i32, i32
  }
  func.func @transform_3(%arg0: i32, %arg1: i32) -> (i32, i32, i32, i32) {
    %c0_i32 = arith.constant 0 : i32
    %c0_i32_0 = arith.constant 0 : i32
    %c0_i32_1 = arith.constant 0 : i32
    return %arg1, %arg0, %c0_i32, %c0_i32_0 : i32, i32, i32, i32
  }
}

</mosaic_0001>

<bundles_post_ra>
// kernel: tpu_custom_call.1
= control target key start
LH: loop header
LB: loop body
LE: loop exit
PB: predicated region body
PF: predicated region fallthrough
CT: control target
= control target key end

     0   :  { %8 = vsyncpa [#allocation5], 0  ;;  %s1578_s0 = inlined_call_operand.hbm [shape: bf16[2,4,8,300], index: 0, kind: input, shape index: {}]   ;;  %s1579_s1 = inlined_call_operand.vmem [shape: bf16[4,8,128], index: 1, kind: input, shape index: {}]   ;;  %s1580_s2 = inlined_call_operand.vmem [shape: f32[4,8,1], index: 2, kind: input, shape index: {}]   ;;  %s1581_s3 = inlined_call_operand.hbm [shape: f32[2,4,8,300], index: 3, kind: output, shape index: {}]  }
   0x1   :  { %10 = vsyncpa [#allocation5 + $0x1], 0 }
   0x2   :  { %11 = vsyncpa [#allocation6], 0 }
   0x3   :  { %13 = vsyncpa [#allocation6 + $0x1], 0  ;;  %s1289_s12 = smov 0   ;;  %s1291_s13 = smov 0  }
   0x4   :  { %s1293_s14 = smov 0   ;;  %s1295_s15 = smov 0  }
   0x5   :  { %s1297_s16 = smov 0   ;;  %s1299_s17 = smov 0  }
   0x6   :  { %s1301_s18 = smov 0   ;;  %s1303_s19 = smov 0  }
   0x7 LB: > { %s884_s20 = sadd.s32 4294967295, %s1251_s19   ;;  %s885_s21 = sadd.s32 4294967294, %s1251_s19   ;;  %s1251_s19 = sphi %s1303_s19, %s19_s19   ;;  %s1247_s18 = sphi %s1301_s18, %s1596_s18   ;;  %s1243_s17 = sphi %s1299_s17, %s1595_s17   ;;  %s1239_s16 = sphi %s1297_s16, %s1594_s16   ;;  %s1235_s15 = sphi %s1295_s15, %s1593_s15   ;;  %s1231_s14 = sphi %s1293_s14, %s1592_s14   ;;  %s1227_s13 = sphi %s1291_s13, %s1591_s13   ;;  %s1223_s12 = sphi %s1289_s12, %s1590_s12  }
   0x8   : > { %s28_s22 = sadd.s32 1, %s1243_s17  ;;  %s31_s23 = sadd.s32 1, %s1247_s18 }
   0x9   : > { %p29_p0 = scmp.ge.s32.totalorder %s28_s22, 2  ;;  %s40_s24 = sadd.s32 1, %s1231_s14 }
   0xa   : > { %p47_p1 = scmp.ne.s32.totalorder %s1231_s14, %s1227_s13  ;;  %p48_p2 = scmp.eq.s32.totalorder %s1251_s19, 0 }
   0xb   : > { %s1598_s22 = smov (%p29_p0, %s28_s22), 0  ;;  %s1600_s23 = smov (!%p29_p0, %s31_s23), %s1247_s18 }
   0xc   : > { %s35_s25 = ssub.s32 %s1243_s17, %s1598_s22  ;;  %p1342_p3 = por %p48_p2, %p47_p1 }
   0xd   : > { %p33_p4 = scmp.ge.s32.totalorder %s1600_s23, 4  ;;  %p53_p5 = scmp.ne.s32.totalorder %s1227_s13, %s1223_s12 }
   0xe   : > { %p54_p6 = scmp.eq.s32.totalorder %s884_s20, 0  ;;  %p131_p7 = scmp.eq.s32.totalorder %s884_s20, 7 }
   0xf   : > { %s1602_s23 = smov (%p33_p4, %s1600_s23), 0  ;;  %p137_p10 = scmp.eq.s32.totalorder %s885_s21, 7 }
  0x10   : > { %1584 = sst [smem:[#allocation10_spill]] %s1602_s23  ;;  %p1350_p8 = por %p54_p6, %p53_p5 }
  0x11   : > { %p1354_p9 = por %p131_p7, %p47_p1  ;;  %s36_s29 = ssub.s32 %s1247_s18, %s1602_s23 }
  0x12   : > { %s37_s30 = sor.u32 %s36_s29, %s35_s25  ;;  %p1360_p12 = por %p137_p10, %p53_p5 }
  0x13   : > { %p38_p11 = scmp.eq.s32.totalorder %s37_s30, 0  ;;  %p1034_p13 = scmp.lt.s32.totalorder %s1251_s19, 8 }
  0x14   : > { %s157_s5 = sand.u32 1, %s1231_s14   ;;  %s1016_s8 = smul.u32 3, %s1247_s18 }
  0x15   : > { %s1367_s6 = scalar_select %p38_p11, %s1231_s14, %s40_s24  }
  0x16   : > { %s1015_s7 = smul.u32 12, %s157_s5  ;;  %p1372_p0 = pnand %p1034_p13, %p1342_p3 }
  0x17   : > { %s1017_s10 = smul.u32 12, %s1243_s17  ;;  %p889_p1 = scmp.ge.s32.totalorder %s1251_s19, 1 }
  0x18   : > { %s161_s11 = scalar_lea.vmem [#allocation4], %s1015_s7  ;;  %p191_p2 = scmp.lt.s32.totalorder %s1251_s19, 9 }
  0x19   : > { %s172_s20 = sshll.u32 %s161_s11, 4  ;;  %s166_s21 = sadd.s32 %s1017_s10, %s1016_s8  ;;  %s173_s20 = int_to_ptr.vmem [resolvable:$true] %s172_s20 }
  0x1a   : > { %s888_s25 = sshll.u32 %s166_s21, 2  ;;  %p192_p4 = pnand %p889_p1, %p191_p2 }
  0x1b   : > { %s168_s24 = scalar_lea.hbm %s1578_s0, %s888_s25  ;;  %s158_s26 = scalar_lea.sflag [#allocation5], %s157_s5 }
  0x1c   : > { %s170_s23 = sshll.u32 %s168_s24, 4  ;;  %195 = sbr.rel (%p192_p4) target bundleno = 451 (0x1c3), region = 32  ;;  %s171_s23 = int_to_ptr.hbm [resolvable:$true] %s170_s23 }
  0x1d   : > { %1029 = dma.hbm_to_vmem [thread:$0]  (!%p1372_p0), %s171_s23, 192, %s173_s20, %s158_s26  }
  0x1e   : > { %s1385_s7 = sand.u32 (!%p192_p4), 1, %s1227_s13  }
  0x1f   : > { %s1018_s8 = smul.u32 (!%p192_p4), 12, %s1385_s7  ;;  %s198_s10 = scalar_lea.sflag (!%p192_p4), [#allocation5], %s1385_s7 }
  0x21   : > { %s201_s11 = scalar_lea.vmem [#allocation4], %s1018_s8 }
  0x22   : > { %1214 = dma.done.wait (%p1350_p8), %s198_s10, 192  }
  0x23   : > { %1216 = vsyncadd (%p1350_p8), %s198_s10, 4294967104  ;;  %vm243_vm0 = vcmask 1043808   ;;  %vm244_vm1 = vcmask 1047556   ;;  %v1253_v0 = vmov 0   ;;  %vm251_vm3 = vcmask 355328   ;;  %v248_v1 = vld [vmem:[%s201_s11] sm:$0xff] }
  0x24   : > { %242 = vst [vmem:[#allocation2] sm:$0xf] %v1253_v0  ;;  %vm245_vm2 = vmor %vm244_vm1, %vm243_vm0  ;;  %1116 = vset.pattern.permute.xlu0 %v1253_v0  ;;  %v249_v2 = vld [vmem:[%s201_s11 + $0x8] sm:$0xf]  ;;  %s1254_s23 = smov 121   ;;  %s1255_s27 = smov 122  }
  0x25   : > { %246 = vst.msk [vmem:[#allocation2 + $0xc] sm:$0xff] %vm245_vm2, %v1253_v0  ;;  %s1256_s5 = smov 124   ;;  %s1257_s9 = smov 123   ;;  %vm269_vm4 = vcmask 1043456   ;;  %vm397_vm5 = vcmask 1014784   ;;  %vm430_vm6 = vcmask 990208  }
  0x26   : > { %250 = vst [vmem:[#allocation2 + $0x4] sm:$0xff] %v248_v1  ;;  %s1258_s20 = smov 126   ;;  %s1259_s21 = smov 125   ;;  %vm419_vm7 = vcmask 998400   ;;  %vm408_vm8 = vcmask 1006592   ;;  %vm386_vm9 = vcmask 1022976  }
  0x27   : > { %252 = vst.msk [vmem:[#allocation2 + $0xc] sm:$0xf] %vm251_vm3, %v249_v2  ;;  %s1260_s25 = smov 127   ;;  %s1261_s29 = smov 2   ;;  %vm375_vm10 = vcmask 1031168   ;;  %vm364_vm11 = vcmask 1039360  }
  0x28   : > { %s1262_s30 = smov 1   ;;  %s1263_s24 = smov 4   ;;  %vm337_vm12 = vcmask 15360   ;;  %vm348_vm13 = vcmask 7168   ;;  %vm315_vm14 = vcmask 31744   ;;  %vm326_vm15 = vcmask 23552  }
  0x29   : > { %s1264_s26 = smov 3   ;;  %s1265_s8 = smov 6   ;;  %vm304_vm0 = vcmask 39936   ;;  %vm293_vm1 = vcmask 48128   ;;  %vm282_vm2 = vcmask 56320  }
  0x2a   : > { %s1266_s10 = smov 5   ;;  %s1267_s11 = smov 8  }
  0x2b   : > { %p233_p3 = scmp.lt.s32.totalorder %s1239_s16, 3 }
  0x2d   : > { %v1394_v3 = vld [vmem:[#allocation2] sm:$0xff] }
  0x2e   : > { %423 = vrot.lane.b32.xlu1 %v1394_v3, %s1254_s23  ;;  %412 = vrot.lane.b32.xlu0 %v1394_v3, %s1255_s27  ;;  %v1399_v4 = vld [vmem:[#allocation2 + $0x8] sm:$0xff]  ;;  %v352_v24 = vrot.slane %v1394_v3, 4 }
  0x2f   : > { %390 = vrot.lane.b32.xlu2 %v1394_v3, %s1256_s5  ;;  %v353_v27 = vrot.slane %v1399_v4, 4 }
  0x31   : > { %v354_v28 = vsel %vm269_vm4, %v352_v24, %v353_v27 }
  0x32   : > { %356 = vst [vmem:[#allocation3 + $0x40] sm:$0xff] %v354_v28 }
  0x36   : > { %425 = vrot.lane.b32.xlu1 %v1399_v4, %s1254_s23  ;;  %414 = vrot.lane.b32.xlu0 %v1399_v4, %s1255_s27 }
  0x37   : > { %392 = vrot.lane.b32.xlu2 %v1399_v4, %s1256_s5 }
  0x39   : > { %v1455_v42 = vld [vmem:[#allocation3 + $0x40] sm:$0xf] }
  0x3a   : > { %629 = vst.msk [vmem:[#allocation3 + $0x40] sm:$0xf] %vm251_vm3, %v353_v27 }
  0x3e   : > { %403 = vrot.lane.b32.xlu1 %v1399_v4, %s1257_s9  ;;  %401 = vrot.lane.b32.xlu0 %v1394_v3, %s1257_s9 }
  0x3f   : > { %368 = vrot.lane.b32.xlu2 %v1394_v3, %s1258_s20 }
  0x46   : > { %379 = vrot.lane.b32.xlu1 %v1394_v3, %s1259_s21  ;;  %370 = vrot.lane.b32.xlu0 %v1399_v4, %s1258_s20 }
  0x47   : > { %381 = vrot.lane.b32.xlu2 %v1399_v4, %s1259_s21 }
  0x4e   : > { %660 = vrot.lane.b32.xlu1 %v1399_v4, %s1254_s23  ;;  %655 = vrot.lane.b32.xlu0 %v1399_v4, %s1255_s27  ;;  %s1268_s23 = smov 7  }
  0x4f   : > { %357 = vrot.lane.b32.xlu2 %v1394_v3, %s1260_s25  ;;  %s1500_s27 = scalar_select %p233_p3, %s1239_s16, 3 }
  0x56   : > { %645 = vrot.lane.b32.xlu1 %v1399_v4, %s1256_s5  ;;  %359 = vrot.lane.b32.xlu0 %v1399_v4, %s1260_s25  ;;  %s891_s5 = sshll.u32 %s1500_s27, 3 }
  0x57   : > { %650 = vrot.lane.b32.xlu2 %v1399_v4, %s1257_s9 }
  0x5e   : > { %332 = vrot.lane.b32.xlu1 %v1399_v4, %s1261_s29  ;;  %330 = vrot.lane.b32.xlu0 %v1394_v3, %s1261_s29 }
  0x5f   : > { %341 = vrot.lane.b32.xlu2 %v1394_v3, %s1262_s30 }
  0x66   : > { %635 = vrot.lane.b32.xlu1 %v1399_v4, %s1258_s20  ;;  %343 = vrot.lane.b32.xlu0 %v1399_v4, %s1262_s30 }
  0x67   : > { %640 = vrot.lane.b32.xlu2 %v1399_v4, %s1259_s21  ;;  %s240_s21 = scalar_lea.vmem %s1580_s2, %s891_s5 }
  0x6e   : > { %310 = vrot.lane.b32.xlu1 %v1399_v4, %s1263_s24  ;;  %308 = vrot.lane.b32.xlu0 %v1394_v3, %s1263_s24 }
  0x6f   : > { %319 = vrot.lane.b32.xlu2 %v1394_v3, %s1264_s26 }
  0x76   : > { %630 = vrot.lane.b32.xlu1 %v1399_v4, %s1260_s25  ;;  %321 = vrot.lane.b32.xlu0 %v1399_v4, %s1264_s26  ;;  %s890_s25 = sshll.u32 %s1500_s27, 2 }
  0x77   : > { %286 = vrot.lane.b32.xlu2 %v1394_v3, %s1265_s8 }
  0x7e   : > { %297 = vrot.lane.b32.xlu1 %v1394_v3, %s1266_s10  ;;  %288 = vrot.lane.b32.xlu0 %v1399_v4, %s1265_s8 }
  0x7f   : > { %299 = vrot.lane.b32.xlu2 %v1399_v4, %s1266_s10 }
  0x86   : > { %621 = vrot.lane.b32.xlu1 %v1399_v4, %s1262_s30  ;;  %615 = vrot.lane.b32.xlu0 %v1399_v4, %s1261_s29 }
  0x87   : > { %263 = vrot.lane.b32.xlu2 %v1394_v3, %s1267_s11 }
  0x89   : > { %v391_v5 = vpop.permute.xlu2 %390 }
  0x8a   : > { %v394_v6 = vrot.slane %v391_v5, 4 }
  0x8e   : > { %275 = vrot.lane.b32.xlu1 %v1394_v3, %s1268_s23  ;;  %265 = vrot.lane.b32.xlu0 %v1399_v4, %s1267_s11 }
  0x8f   : > { %277 = vrot.lane.b32.xlu2 %v1399_v4, %s1268_s23 }
  0x91   : > { %v393_v7 = vpop.permute.xlu2 %392 }
  0x92   : > { %v395_v8 = vrot.slane %v393_v7, 4 }
  0x94   : > { %v396_v9 = vsel %vm269_vm4, %v394_v6, %v395_v8 }
  0x95   : > { %v398_v10 = vsel %vm397_vm5, %v396_v9, %v393_v7  ;;  %vm271_vm5 = vcmask 64512  }
  0x96   : > { %609 = vrot.lane.b32.xlu1 %v1399_v4, %s1264_s26  ;;  %603 = vrot.lane.b32.xlu0 %v1399_v4, %s1263_s24  ;;  %400 = vst [vmem:[#allocation3 + $0x60] sm:$0xff] %v398_v10  ;;  %s236_s24 = scalar_lea.vmem %s1579_s1, %s890_s25  ;;  %s1019_s26 = smul.u32 24, %s1385_s7 }
  0x97   : > { %591 = vrot.lane.b32.xlu2 %v1399_v4, %s1265_s8 }
  0x98   : > { %s232_s8 = scalar_lea.vmem [#allocation7], %s1019_s26  ;;  %s1173_s26 = scalar_lea.hbm %s1581_s3, 192 }
  0x99   : > { %v369_v11 = vpop.permute.xlu2 %368 }
  0x9a   : > { %v372_v46 = vrot.slane %v369_v11, 4 }
  0x9d   : > { %v942_v52 = vld [vmem:[#allocation3 + $0x60] sm:$0xf]  ;;  %v1003_v57 = vld [vmem:[#allocation3 + $0x64] sm:$0xf] }
  0x9e   : > { %597 = vrot.lane.b32.xlu0 %v1399_v4, %s1266_s10  ;;  %579 = vrot.lane.b32.xlu1 %v1399_v4, %s1267_s11  ;;  %s1020_s10 = smul.u32 3, %s1239_s16 }
  0x9f   : > { %585 = vrot.lane.b32.xlu2 %v1399_v4, %s1268_s23  ;;  %s1021_s11 = smul.u32 12, %s1235_s15  ;;  %s755_s15 = scalar_lea.sflag [#allocation6], %s1385_s7 }
  0xa0   : > { %v424_v12 = vpop.permute.xlu1 %423  ;;  %v413_v13 = vpop.permute.xlu0 %412 }
  0xa1   : > { %v382_v14 = vpop.permute.xlu2 %381  ;;  %v427_v17 = vrot.slane %v424_v12, 4  ;;  %v416_v18 = vrot.slane %v413_v13, 4  ;;  %s766_s23 = sadd.s32 %s1021_s11, %s1020_s10 }
  0xa2   : > { %v384_v43 = vrot.slane %v382_v14, 4  ;;  %s988_s27 = sshll.u32 %s766_s23, 3 }
  0xa3   : > { %s768_s20 = scalar_lea.hbm %s1581_s3, %s988_s27 }
  0xa4   : > { %s772_s25 = sshll.u32 %s768_s20, 4  ;;  %s773_s25 = int_to_ptr.hbm [resolvable:$true] %s772_s25 }
  0xa5   : > { %s1167_s16 = sshra.s32 %s773_s25, 4  ;;  %s1168_s16 = int_to_ptr.hbm [resolvable:$true] %s1167_s16 }
  0xa6   : > { %s1169_s29 = scalar_lea.hbm %s1168_s16, 24  ;;  %p1174_p8 = scmp.lt.s32.totalorder %s1168_s16, %s1581_s3 }
  0xa7   : > { %p1170_p5 = scmp.ne.s32.totalorder %s1168_s16, %s1169_s29  ;;  %p1175_p10 = scmp.lt.s32.totalorder %s1173_s26, %s1169_s29 }
  0xa8   : > { %v426_v15 = vpop.permute.xlu1 %425  ;;  %v415_v16 = vpop.permute.xlu0 %414 }
  0xa9   : > { %v428_v19 = vrot.slane %v426_v15, 4  ;;  %v417_v20 = vrot.slane %v415_v16, 4  ;;  %v1447_v21 = vpop.permute.xlu2 %357  ;;  %p1171_p6 = pnand %p1170_p5, %p1354_p9  ;;  %p1176_p11 = por %p1175_p10, %p1174_p8 }
  0xaa   : > { %v361_v11 = vrot.slane %v1447_v21, 4 }
  0xab   : > { %v429_v22 = vsel %vm269_vm4, %v427_v17, %v428_v19  ;;  %v418_v23 = vsel %vm269_vm4, %v416_v18, %v417_v20  ;;  %p1172_p7 = pneg %p1171_p6 }
  0xac   : > { %v431_v25 = vsel %vm430_vm6, %v429_v22, %v426_v15  ;;  %v420_v26 = vsel %vm419_vm7, %v418_v23, %v415_v16 }
  0xad   : > { %433 = vst [vmem:[#allocation3 + $0x78] sm:$0xff] %v431_v25  ;;  %p1177_p13 = pnand %p1176_p11, %p1172_p7 }
  0xae   : > { %422 = vst [vmem:[#allocation3 + $0x70] sm:$0xff] %v420_v26  ;;  %v999_v26 = vld [vmem:[#allocation3 + $0x44] sm:$0xf] }
  0xb0   : > { %v404_v29 = vpop.permute.xlu1 %403  ;;  %v402_v30 = vpop.permute.xlu0 %401 }
  0xb1   : > { %v406_v31 = vrot.slane %v404_v29, 4  ;;  %v405_v32 = vrot.slane %v402_v30, 4  ;;  %v651_v33 = vpop.permute.xlu2 %650 }
  0xb2   : > { %v652_v53 = vrot.slane %v651_v33, 4 }
  0xb3   : > { %v407_v34 = vsel %vm269_vm4, %v405_v32, %v406_v31 }
  0xb4   : > { %v409_v35 = vsel %vm408_vm8, %v407_v34, %v404_v29  ;;  %v1006_v36 = vld [vmem:[#allocation3 + $0x74] sm:$0xf0]  ;;  %v952_v37 = vld [vmem:[#allocation3 + $0x78] sm:$0xf0] }
  0xb5   : > { %411 = vst [vmem:[#allocation3 + $0x68] sm:$0xff] %v409_v35  ;;  %v950_v38 = vld [vmem:[#allocation3 + $0x70] sm:$0xf]  ;;  %v1005_v39 = vld [vmem:[#allocation3 + $0x74] sm:$0xf] }
  0xb6   : > { %v951_v40 = vor.u32 %v1006_v36, %v950_v38  ;;  %v955_v41 = vor.u32 %v1005_v39, %v952_v37 }
  0xb8   : > { %531 = vmatpush.bf16.msra.mxu0 %v951_v40  ;;  %544 = vmatpush.bf16.msra.mxu1 %v955_v41  ;;  %v380_v44 = vpop.permute.xlu1 %379  ;;  %v371_v45 = vpop.permute.xlu0 %370 }
  0xb9   : > { %v383_v47 = vrot.slane %v380_v44, 4  ;;  %v373_v48 = vrot.slane %v371_v45, 4  ;;  %v1458_v49 = vpop.permute.xlu2 %341 }
  0xba   : > { %v345_v37 = vrot.slane %v1458_v49, 4 }
  0xbb   : > { %v385_v50 = vsel %vm269_vm4, %v383_v47, %v384_v43  ;;  %v374_v51 = vsel %vm269_vm4, %v372_v46, %v373_v48 }
  0xbc   : > { %v387_v54 = vsel %vm386_vm9, %v385_v50, %v382_v14  ;;  %v376_v55 = vsel %vm375_vm10, %v374_v51, %v371_v45  ;;  %v1004_v56 = vld [vmem:[#allocation3 + $0x64] sm:$0xf0]  ;;  %v944_v58 = vld [vmem:[#allocation3 + $0x68] sm:$0xf0] }
  0xbd   : > { %389 = vst [vmem:[#allocation3 + $0x58] sm:$0xff] %v387_v54  ;;  %v943_v59 = vor.u32 %v1004_v56, %v942_v52  ;;  %v947_v60 = vor.u32 %v1003_v57, %v944_v58 }
  0xbe   : > { %378 = vst [vmem:[#allocation3 + $0x50] sm:$0xff] %v376_v55 }
  0xbf   : > { %532 = vmatpush.bf16.msra.mxu0 %v943_v59  ;;  %545 = vmatpush.bf16.msra.mxu1 %v947_v60  ;;  %654 = vst.msk [vmem:[#allocation3 + $0x68] sm:$0xf] %vm251_vm3, %v652_v53 }
  0xc0   : > { %v661_v61 = vpop.permute.xlu1 %660  ;;  %v656_v62 = vpop.permute.xlu0 %655 }
  0xc1   : > { %v662_v63 = vrot.slane %v661_v61, 4  ;;  %v657_v0 = vrot.slane %v656_v62, 4  ;;  %v641_v1 = vpop.permute.xlu2 %640 }
  0xc2   : > { %v642_v2 = vrot.slane %v641_v1, 4 }
  0xc3   : > { %664 = vst.msk [vmem:[#allocation3 + $0x78] sm:$0xf] %vm251_vm3, %v662_v63 }
  0xc4   : > { %659 = vst.msk [vmem:[#allocation3 + $0x70] sm:$0xf] %vm251_vm3, %v657_v0  ;;  %v1002_v3 = vld [vmem:[#allocation3 + $0x54] sm:$0xf0]  ;;  %v936_v4 = vld [vmem:[#allocation3 + $0x58] sm:$0xf0] }
  0xc5   : > { %v934_v5 = vld [vmem:[#allocation3 + $0x50] sm:$0xf]  ;;  %v1001_v6 = vld [vmem:[#allocation3 + $0x54] sm:$0xf]  ;;  %644 = vst.msk [vmem:[#allocation3 + $0x58] sm:$0xf] %vm251_vm3, %v642_v2 }
  0xc6   : > { %v935_v7 = vor.u32 %v1002_v3, %v934_v5  ;;  %v939_v8 = vor.u32 %v1001_v6, %v936_v4  ;;  %v1013_v23 = vld [vmem:[#allocation3 + $0x64] sm:$0xf0]  ;;  %v974_v6 = vld [vmem:[#allocation3 + $0x40] sm:$0xf] }
  0xc8   : > { %533 = vmatpush.bf16.msra.mxu0 %v935_v7  ;;  %546 = vmatpush.bf16.msra.mxu1 %v939_v8  ;;  %v646_v9 = vpop.permute.xlu1 %645  ;;  %v360_v10 = vpop.permute.xlu0 %359 }
  0xc9   : > { %v647_v12 = vrot.slane %v646_v9, 4  ;;  %v362_v13 = vrot.slane %v360_v10, 4  ;;  %v1467_v14 = vpop.permute.xlu2 %319 }
  0xca   : > { %v1014_v15 = vld [vmem:[#allocation3 + $0x74] sm:$0xf0]  ;;  %v323_v61 = vrot.slane %v1467_v14, 4 }
  0xcb   : > { %649 = vst.msk [vmem:[#allocation3 + $0x60] sm:$0xf] %vm251_vm3, %v647_v12  ;;  %v363_v16 = vsel %vm269_vm4, %v361_v11, %v362_v13  ;;  %v986_v17 = vld [vmem:[#allocation3 + $0x70] sm:$0xf] }
  0xcc   : > { %v365_v18 = vsel %vm364_vm11, %v363_v16, %v360_v10  ;;  %v987_v19 = vor.u32 %v1014_v15, %v986_v17  ;;  %v1012_v45 = vld [vmem:[#allocation3 + $0x54] sm:$0xf0] }
  0xcd   : > { %367 = vst [vmem:[#allocation3 + $0x48] sm:$0xff] %v365_v18 }
  0xce   : > { %730 = vmatpush.bf16.msra.mxu2 %v987_v19 }
  0xd0   : > { %v333_v20 = vpop.permute.xlu1 %332  ;;  %v331_v22 = vpop.permute.xlu0 %330 }
  0xd1   : > { %v335_v24 = vrot.slane %v333_v20, 4  ;;  %v334_v21 = vrot.slane %v331_v22, 4  ;;  %v1471_v25 = vpop.permute.xlu2 %286 }
  0xd2   : > { %v982_v27 = vld [vmem:[#allocation3 + $0x60] sm:$0xf]  ;;  %v290_v7 = vrot.slane %v1471_v25, 4 }
  0xd3   : > { %v336_v28 = vsel %vm269_vm4, %v334_v21, %v335_v24  ;;  %v983_v29 = vor.u32 %v1013_v23, %v982_v27 }
  0xd4   : > { %v338_v30 = vsel %vm337_vm12, %v331_v22, %v336_v28  ;;  %v1000_v31 = vld [vmem:[#allocation3 + $0x44] sm:$0xf0]  ;;  %v928_v32 = vld [vmem:[#allocation3 + $0x48] sm:$0xf0] }
  0xd5   : > { %340 = vst [vmem:[#allocation3 + $0x30] sm:$0xff] %v338_v30  ;;  %v927_v33 = vor.u32 %v1000_v31, %v1455_v42  ;;  %v931_v34 = vor.u32 %v999_v26, %v928_v32  ;;  %731 = vmatpush.bf16.msra.mxu2 %v983_v29 }
  0xd7   : > { %534 = vmatpush.bf16.msra.mxu0 %v927_v33  ;;  %547 = vmatpush.bf16.msra.mxu1 %v931_v34 }
  0xd8   : > { %v636_v35 = vpop.permute.xlu1 %635  ;;  %v344_v36 = vpop.permute.xlu0 %343 }
  0xd9   : > { %v637_v38 = vrot.slane %v636_v35, 4  ;;  %v346_v39 = vrot.slane %v344_v36, 4  ;;  %v300_v40 = vpop.permute.xlu2 %299 }
  0xda   : > { %v302_v3 = vrot.slane %v300_v40, 4 }
  0xdb   : > { %639 = vst.msk [vmem:[#allocation3 + $0x50] sm:$0xf] %vm251_vm3, %v637_v38  ;;  %v347_v41 = vsel %vm269_vm4, %v345_v37, %v346_v39 }
  0xdc   : > { %v349_v43 = vsel %vm348_vm13, %v1458_v49, %v347_v41  ;;  %v918_v52 = vld [vmem:[#allocation3 + $0x30] sm:$0xf]  ;;  %v997_v56 = vld [vmem:[#allocation3 + $0x34] sm:$0xf] }
  0xdd   : > { %351 = vst [vmem:[#allocation3 + $0x38] sm:$0xff] %v349_v43 }
  0xe0   : > { %v311_v42 = vpop.permute.xlu1 %310  ;;  %v309_v44 = vpop.permute.xlu0 %308 }
  0xe1   : > { %v313_v46 = vrot.slane %v311_v42, 4  ;;  %v312_v47 = vrot.slane %v309_v44, 4  ;;  %v1481_v50 = vpop.permute.xlu2 %263  ;;  %v253_v42 = vld [vmem:[%s240_s21] sm:$0xff]  ;;  %s770_s21 = sshll.u32 %s232_s8, 4  ;;  %s771_s21 = int_to_ptr.vmem [resolvable:$true] %s770_s21 }
  0xe2   : > { %v978_v48 = vld [vmem:[#allocation3 + $0x50] sm:$0xf]  ;;  %v267_v40 = vrot.slane %v1481_v50, 4  ;;  %256 = vperm.xlu0 %1116, %v253_v42  }
  0xe3   : > { %v314_v51 = vsel %vm269_vm4, %v312_v47, %v313_v46  ;;  %v979_v53 = vor.u32 %v1012_v45, %v978_v48 }
  0xe4   : > { %v316_v54 = vsel %vm315_vm14, %v309_v44, %v314_v51  ;;  %v998_v55 = vld [vmem:[#allocation3 + $0x34] sm:$0xf0]  ;;  %v920_v57 = vld [vmem:[#allocation3 + $0x38] sm:$0xf0] }
  0xe5   : > { %318 = vst [vmem:[#allocation3 + $0x20] sm:$0xff] %v316_v54  ;;  %v919_v49 = vor.u32 %v998_v55, %v918_v52  ;;  %v923_v58 = vor.u32 %v997_v56, %v920_v57  ;;  %732 = vmatpush.bf16.msra.mxu2 %v979_v53 }
  0xe7   : > { %535 = vmatpush.bf16.msra.mxu0 %v919_v49  ;;  %548 = vmatpush.bf16.msra.mxu1 %v923_v58 }
  0xe8   : > { %v631_v59 = vpop.permute.xlu1 %630  ;;  %v322_v60 = vpop.permute.xlu0 %321 }
  0xe9   : > { %v632_v62 = vrot.slane %v631_v59, 4  ;;  %v324_v63 = vrot.slane %v322_v60, 4  ;;  %v1490_v2 = vpop.permute.xlu2 %277 }
  0xea   : > { %v280_v37 = vrot.slane %v1490_v2, 4 }
  0xeb   : > { %634 = vst.msk [vmem:[#allocation3 + $0x48] sm:$0xf] %vm251_vm3, %v632_v62  ;;  %v325_v0 = vsel %vm269_vm4, %v323_v61, %v324_v63 }
  0xec   : > { %v327_v1 = vsel %vm326_vm15, %v1467_v14, %v325_v0  ;;  %v910_v13 = vld [vmem:[#allocation3 + $0x20] sm:$0xf]  ;;  %v995_v18 = vld [vmem:[#allocation3 + $0x24] sm:$0xf] }
  0xed   : > { %329 = vst [vmem:[#allocation3 + $0x28] sm:$0xff] %v327_v1 }
  0xf0   : > { %v298_v4 = vpop.permute.xlu1 %297  ;;  %v289_v5 = vpop.permute.xlu0 %288 }
  0xf1   : > { %v301_v8 = vrot.slane %v298_v4, 4  ;;  %v291_v9 = vrot.slane %v289_v5, 4  ;;  %v592_v20 = vpop.permute.xlu2 %591 }
  0xf2   : > { %v1011_v10 = vld [vmem:[#allocation3 + $0x44] sm:$0xf0]  ;;  %v593_v24 = vrot.slane %v592_v20, 4 }
  0xf3   : > { %v303_v11 = vsel %vm269_vm4, %v301_v8, %v302_v3  ;;  %v292_v12 = vsel %vm269_vm4, %v290_v7, %v291_v9  ;;  %v975_v14 = vor.u32 %v1011_v10, %v974_v6 }
  0xf4   : > { %v305_v15 = vsel %vm304_vm0, %v298_v4, %v303_v11  ;;  %v294_v16 = vsel %vm293_vm1, %v1471_v25, %v292_v12  ;;  %v996_v17 = vld [vmem:[#allocation3 + $0x24] sm:$0xf0]  ;;  %v912_v19 = vld [vmem:[#allocation3 + $0x28] sm:$0xf0]  ;;  %v594_v30 = vsel %vm293_vm1, %v592_v20, %v593_v24 }
  0xf5   : > { %307 = vst [vmem:[#allocation3 + $0x18] sm:$0xff] %v305_v15  ;;  %v911_v22 = vor.u32 %v996_v17, %v910_v13  ;;  %v915_v23 = vor.u32 %v995_v18, %v912_v19  ;;  %733 = vmatpush.bf16.msra.mxu2 %v975_v14  ;;  %v434_v4 = vld [vmem:[%s236_s24] sm:$0xf] }
  0xf6   : > { %296 = vst [vmem:[#allocation3 + $0x10] sm:$0xff] %v294_v16  ;;  %v665_v18 = vld [vmem:[%s236_s24] sm:$0xf] }
  0xf7   : > { %536 = vmatpush.bf16.msra.mxu0 %v911_v22  ;;  %549 = vmatpush.bf16.msra.mxu1 %v915_v23 }
  0xf8   : > { %v622_v21 = vpop.permute.xlu1 %621  ;;  %v616_v26 = vpop.permute.xlu0 %615 }
  0xf9   : > { %v623_v27 = vrot.slane %v622_v21, 4  ;;  %v617_v28 = vrot.slane %v616_v26, 4  ;;  %v586_v52 = vpop.permute.xlu2 %585 }
  0xfa   : > { %v587_v54 = vrot.slane %v586_v52, 4 }
  0xfb   : > { %v624_v25 = vsel %vm348_vm13, %v622_v21, %v623_v27  ;;  %v618_v29 = vsel %vm337_vm12, %v616_v26, %v617_v28 }
  0xfc   : > { %626 = vst.msk [vmem:[#allocation3 + $0x38] sm:$0xf] %vm251_vm3, %v624_v25  ;;  %v994_v31 = vld [vmem:[#allocation3 + $0x14] sm:$0xf0]  ;;  %v904_v32 = vld [vmem:[#allocation3 + $0x18] sm:$0xf0]  ;;  %v588_v60 = vsel %vm282_vm2, %v586_v52, %v587_v54 }
  0xfd   : > { %620 = vst.msk [vmem:[#allocation3 + $0x30] sm:$0xf] %vm251_vm3, %v618_v29  ;;  %v902_v33 = vld [vmem:[#allocation3 + $0x10] sm:$0xf]  ;;  %v993_v34 = vld [vmem:[#allocation3 + $0x14] sm:$0xf] }
  0xfe   : > { %v903_v35 = vor.u32 %v994_v31, %v902_v33  ;;  %v907_v36 = vor.u32 %v993_v34, %v904_v32  ;;  %596 = vst.msk [vmem:[#allocation3 + $0x10] sm:$0xf] %vm251_vm3, %v594_v30 }
 0x100   : > { %537 = vmatpush.bf16.msra.mxu0 %v903_v35  ;;  %550 = vmatpush.bf16.msra.mxu1 %v907_v36  ;;  %v276_v38 = vpop.permute.xlu1 %275  ;;  %v266_v39 = vpop.permute.xlu0 %265 }
 0x101   : > { %v279_v41 = vrot.slane %v276_v38, 4  ;;  %v268_v43 = vrot.slane %v266_v39, 4 }
 0x103   : > { %v281_v44 = vsel %vm269_vm4, %v279_v41, %v280_v37  ;;  %v270_v45 = vsel %vm269_vm4, %v267_v40, %v268_v43  ;;  %v1010_v46 = vld [vmem:[#allocation3 + $0x34] sm:$0xf0] }
 0x104   : > { %v283_v47 = vsel %vm282_vm2, %v276_v38, %v281_v44  ;;  %v272_v48 = vsel %vm271_vm5, %v1481_v50, %v270_v45  ;;  %v970_v51 = vld [vmem:[#allocation3 + $0x30] sm:$0xf] }
 0x105   : > { %285 = vst [vmem:[#allocation3 + $0x8] sm:$0xff] %v283_v47  ;;  %v971_v53 = vor.u32 %v1010_v46, %v970_v51  ;;  %v962_v12 = vld [vmem:[#allocation3 + $0x10] sm:$0xf] }
 0x106   : > { %274 = vst [vmem:[#allocation3] sm:$0xff] %v272_v48 }
 0x107   : > { %734 = vmatpush.bf16.msra.mxu2 %v971_v53 }
 0x108   : > { %v610_v55 = vpop.permute.xlu1 %609  ;;  %v604_v56 = vpop.permute.xlu0 %603 }
 0x109   : > { %v611_v57 = vrot.slane %v610_v55, 4  ;;  %v605_v49 = vrot.slane %v604_v56, 4 }
 0x10b   : > { %v612_v58 = vsel %vm326_vm15, %v610_v55, %v611_v57  ;;  %v606_v59 = vsel %vm315_vm14, %v604_v56, %v605_v49 }
 0x10c   : > { %614 = vst.msk [vmem:[#allocation3 + $0x28] sm:$0xf] %vm251_vm3, %v612_v58  ;;  %v992_v50 = vld [vmem:[#allocation3 + $0x4] sm:$0xf0]  ;;  %v896_v61 = vld [vmem:[#allocation3 + $0x8] sm:$0xf0] }
 0x10d   : > { %608 = vst.msk [vmem:[#allocation3 + $0x20] sm:$0xf] %vm251_vm3, %v606_v59  ;;  %v894_v62 = vld [vmem:[#allocation3] sm:$0xf]  ;;  %v991_v63 = vld [vmem:[#allocation3 + $0x4] sm:$0xf] }
 0x10e   : > { %v895_v0 = vor.u32 %v992_v50, %v894_v62  ;;  %v899_v1 = vor.u32 %v991_v63, %v896_v61  ;;  %590 = vst.msk [vmem:[#allocation3 + $0x8] sm:$0xf] %vm251_vm3, %v588_v60 }
 0x110   : > { %538 = vmatpush.bf16.msra.mxu0 %v895_v0  ;;  %551 = vmatpush.bf16.msra.mxu1 %v899_v1  ;;  %v598_v2 = vpop.permute.xlu0 %597  ;;  %v580_v3 = vpop.permute.xlu1 %579 }
 0x111   : > { %v599_v5 = vrot.slane %v598_v2, 4  ;;  %v581_v6 = vrot.slane %v580_v3, 4 }
 0x113   : > { %v600_v7 = vsel %vm304_vm0, %v598_v2, %v599_v5  ;;  %v582_v8 = vsel %vm271_vm5, %v580_v3, %v581_v6  ;;  %v1009_v9 = vld [vmem:[#allocation3 + $0x24] sm:$0xf0]  ;;  %539 = vmatmul.bf16.vlgmr.msra.gmra.mxu0 %v434_v4  ;;  %552 = vmatmul.bf16.vlgmr.msra.gmra.mxu1 %v434_v4 }
 0x114   : > { %602 = vst.msk [vmem:[#allocation3 + $0x18] sm:$0xf] %vm251_vm3, %v600_v7  ;;  %v966_v10 = vld [vmem:[#allocation3 + $0x20] sm:$0xf] }
 0x115   : > { %584 = vst.msk [vmem:[#allocation3] sm:$0xf] %vm251_vm3, %v582_v8  ;;  %v967_v11 = vor.u32 %v1009_v9, %v966_v10  ;;  %v1007_v16 = vld [vmem:[#allocation3 + $0x4] sm:$0xf0]  ;;  %vm752_vm3 = vcmask 359424  }
 0x117   : > { %735 = vmatpush.bf16.msra.mxu2 %v967_v11 }
 0x11b   : > { %v1008_v13 = vld [vmem:[#allocation3 + $0x14] sm:$0xf0] }
 0x11c   : > { %v963_v14 = vor.u32 %v1008_v13, %v962_v12  ;;  %v958_v15 = vld [vmem:[#allocation3] sm:$0xf] }
 0x11d   : > { %v959_v17 = vor.u32 %v1007_v16, %v958_v15 }
 0x11e   : > { %736 = vmatpush.bf16.msra.mxu2 %v963_v14 }
 0x122   : > { %737 = vmatpush.bf16.msra.mxu2 %v959_v17 }
 0x125   : > { %738 = vmatmul.bf16.vlgmr.msra.gmra.mxu2 %v665_v18 }
 0x154   : > { %v257_v19 = vpop.permute.xlu0 %256 }
 0x190   : > { %v540_v20 = vpop.f32.mrf.mxu0  ;;  %v553_v22 = vpop.f32.mrf.mxu1 }
 0x191   : > { %v541_v23 = vadd.f32 %v540_v20, %v257_v19  ;;  %v554_v24 = vadd.f32 %v553_v22, %v257_v19 }
 0x193   : > { %v559_v21 = vmul.f32 0.044715, %v541_v23  ;;  %v560_v26 = vmul.f32 0.044715, %v554_v24  ;;  %v557_v36 = vmul.f32 0.5, %v541_v23  ;;  %v558_v38 = vmul.f32 0.5, %v554_v24 }
 0x195   : > { %v561_v27 = vmul.f32 %v559_v21, %v541_v23  ;;  %v562_v28 = vmul.f32 %v560_v26, %v554_v24 }
 0x197   : > { %v563_v25 = vmul.f32 %v561_v27, %v541_v23  ;;  %v564_v29 = vmul.f32 %v562_v28, %v554_v24 }
 0x198   : > { %v542_v30 = vpop.f32.mrf.mxu0  ;;  %v555_v31 = vpop.f32.mrf.mxu1 }
 0x199   : > { %v565_v32 = vadd.f32 %v563_v25, %v541_v23  ;;  %v566_v33 = vadd.f32 %v564_v29, %v554_v24 }
 0x19b   : > { %v567_v34 = vmul.f32 0.7978846, %v565_v32  ;;  %v568_v35 = vmul.f32 0.7978846, %v566_v33 }
 0x19d   : > { %1117 = vtanh.f32 %v567_v34 }
 0x19e   : > { %1119 = vtanh.f32 %v568_v35 }
 0x1a3   : > { %v1118_v37 = vpop.eup %1117 }
 0x1a4   : > { %v1120_v39 = vpop.eup %1119  ;;  %v571_v40 = vadd.f32 1.0, %v1118_v37 }
 0x1a5   : > { %v572_v41 = vadd.f32 1.0, %v1120_v39 }
 0x1a6   : > { %v573_v43 = vmul.f32 %v571_v40, %v557_v36 }
 0x1a7   : > { %v574_v42 = vmul.f32 %v572_v41, %v558_v38 }
 0x1a8   : > { %v739_v44 = vpop.f32.mrf.mxu2  ;;  %575 = vst [vmem:[%s232_s8] sm:$0xff] %v573_v43 }
 0x1a9   : > { %v740_v45 = vadd.f32 %v739_v44, %v257_v19  ;;  %576 = vst [vmem:[%s232_s8 + $0x8] sm:$0xff] %v574_v42 }
 0x1ab   : > { %v744_v46 = vmul.f32 0.044715, %v740_v45  ;;  %v743_v55 = vmul.f32 0.5, %v740_v45 }
 0x1ad   : > { %v745_v47 = vmul.f32 %v744_v46, %v740_v45 }
 0x1af   : > { %v746_v48 = vmul.f32 %v745_v47, %v740_v45 }
 0x1b0   : > { %v741_v51 = vpop.f32.mrf.mxu2 }
 0x1b1   : > { %v747_v52 = vadd.f32 %v746_v48, %v740_v45 }
 0x1b3   : > { %v748_v53 = vmul.f32 0.7978846, %v747_v52 }
 0x1b5   : > { %1121 = vtanh.f32 %v748_v53 }
 0x1bb   : > { %v1122_v54 = vpop.eup %1121 }
 0x1bc   : > { %v750_v56 = vadd.f32 1.0, %v1122_v54 }
 0x1be   : > { %v751_v57 = vmul.f32 %v750_v56, %v743_v55 }
 0x1c0   : > { %753 = vst.msk [vmem:[%s232_s8 + $0x10] sm:$0xff] %vm752_vm3, %v751_v57 }
 0x1c1   : > { %1180 = shalt.err (!%p1177_p13)
}
 0x1c2   : > { %1024 = dma.vmem_to_hbm [thread:$0]  (%p1354_p9), %s771_s21, 384, %s773_s25, %s755_s15  }
 0x1c3 PF: > { %p1035_p0 = scmp.ge.s32.totalorder %s1251_s19, 2  ;;  %s784_s7 = sand.u32 1, %s1223_s12  }
 0x1c4   : > { %s785_s8 = scalar_lea.sflag [#allocation6], %s784_s7 }
 0x1c5   : > { %p1031_p1 = pnand %p1035_p0, %p1360_p12 }
 0x1c7   : > { %p1032_p2 = pneg %p1031_p1 }
 0x1c9   : > { %1218 = dma.done.wait (%p1032_p2), %s785_s8, 384  }
 0x1ca   : > { %1220 = vsyncadd (%p1032_p2), %s785_s8, 4294966912  ;;  %s19_s19 = sadd.s32 1, %s1251_s19   ;;  %s1589_s28 = sld [smem:[#allocation10_spill]] }
 0x1cb   : > { %p16_p4 = scmp.ge.s32.totalorder %s19_s19, 10   ;;  %s1590_s12 = smov %s1227_s13 }
 0x1cc   : > { %s1591_s13 = smov %s1231_s14  ;;  %s1592_s14 = smov %s1367_s6 }
 0x1cd   : > { %s1593_s15 = smov %s1243_s17  ;;  %s1594_s16 = smov %s1247_s18 }
 0x1ce   : > { %s1595_s17 = smov %s1598_s22  ;;  %18 = sbr.rel (!%p16_p4) target bundleno = 7 (0x7), region = 83 }
 0x1d0   : > { %s1596_s18 = smov %s1589_s28 }
 0x1d3   :  { %791 = vsyncpa [#allocation5], 1 }
 0x1d4   :  { %793 = vsyncpa [#allocation5 + $0x1], 1 }
 0x1d5   :  { %794 = vsyncpa [#allocation6], 1 }
 0x1d6   :  { %796 = vsyncpa [#allocation6 + $0x1], 1 }

</bundles_post_ra>
